<compile_context>
chip_gen: v7x
topology: tpu7x:2x2x1
jax: 0.10.0
libtpu: 0.0.40
codegen_flags: <defaults>
</compile_context>

<pallas_src>
import math
import functools

import jax
import jax.numpy as jnp
from jax.experimental import pallas as pl
from jax.experimental.pallas import tpu as pltpu

BN_EPS = 1e-5
LOG_SQRT_2PI = 0.5 * math.log(2.0 * math.pi)
OUT_LANES = 128  # lane-dense output slab (multiple of 128 -> unmasked store)


def _softplus(x):
    # numerically stable softplus = log(1 + exp(x))
    return jnp.maximum(x, 0.0) + jnp.log1p(jnp.exp(-jnp.abs(x)))


def _pad_lanes(v, total_lanes):
    # Constant zero-pad up to the lane-dense slab width (== jnp.pad, written
    # as concatenate-with-splat, the proven Mosaic lowering).
    pad = total_lanes - v.shape[1]
    return jnp.concatenate([v, jnp.zeros((v.shape[0], pad), jnp.float32)], axis=1)


def policy_net_kernel(action_bound, action_dim,
                      x_ref, eps_ref,
                      w1_ref,            # (state_dim, H)   bf16
                      w26_ref,           # (5, H, H)        bf16  (layers 2..6)
                      whead_ref,         # (2, H, A)        bf16  ([mu, std])
                      bhead_ref,         # (2, 1, A)        f32   ([mu, std])
                      gb_ref,            # (2, H)           f32   (gamma, beta)
                      out_ref):          # (B, OUT_LANES)   f32
    x = x_ref[...]                       # (B, state_dim) f32
    H = gb_ref.shape[1]
    gamma = gb_ref[0:1, :]               # (1, H)
    beta = gb_ref[1:2, :]                # (1, H)
    inv_b = 1.0 / x.shape[0]

    def mm(a, w):
        # MXU matmul: activations cast to the weight dtype (bf16), f32 accumulate.
        return jnp.dot(a.astype(w.dtype), w, preferred_element_type=jnp.float32)

    def bn_relu(y):
        # Shared BatchNorm1d, training mode (biased batch variance, eps=1e-5),
        # folded to per-feature scale/shift.  Batch stats via ONE fused
        # cross-sublane reduction over [y | y*y] (2H lanes fit one vreg).
        s = jnp.sum(jnp.concatenate([y, y * y], axis=1), axis=0, keepdims=True) * inv_b
        mean = s[:, :H]
        ex2 = s[:, H:]
        var = jnp.maximum(ex2 - mean * mean, 0.0)
        scale = gamma * jax.lax.rsqrt(var + BN_EPS)
        shift = beta - mean * scale
        return jnp.maximum(y * scale + shift, 0.0)        # F.relu

    # Hidden-layer biases omitted: BN's mean subtraction cancels any
    # per-feature constant added before it, so bn(h@W + b) == bn(h@W).
    h = bn_relu(mm(x, w1_ref[...]))                        # layer 1
    for i in range(w26_ref.shape[0]):                      # layers 2..6, unrolled
        h = bn_relu(mm(h, w26_ref[i]))

    # mu / std heads: two lane-aligned (H, A) matmuls (no cross-lane slice).
    mu = mm(h, whead_ref[0]) + bhead_ref[0]
    std = _softplus(mm(h, whead_ref[1]) + bhead_ref[1])

    eps = eps_ref[...]                                     # (B, A), eps ~ N(0,1)
    sample = mu + std * eps                                # dist.rsample()

    # Normal(mu, std).log_prob(sample), using sample - mu == std * eps
    log_prob = -0.5 * eps * eps - jnp.log(std) - LOG_SQRT_2PI

    action = jnp.tanh(sample)
    # Faithful to the reference: correction uses tanh(action) (double tanh).
    log_prob = log_prob - jnp.log(1.0 - jnp.tanh(action) ** 2 + 1e-07)
    action = action * action_bound

    logp = jnp.sum(log_prob, axis=1, keepdims=True)        # (B, 1)

    # Single unmasked lane-dense store: [action | logp | 0...] -> (B, 128).
    out_ref[...] = _pad_lanes(jnp.concatenate([action, logp], axis=1),
                              out_ref.shape[1])


def pack_params(params, weights_dtype=jnp.bfloat16):
    """Pack per-layer parameters into a handful of stacked kernel operands.

    Hidden-layer biases (b1..b6) are intentionally not shipped: they are
    exactly cancelled by the training-mode BatchNorm that follows every
    hidden Linear."""
    wd = weights_dtype
    return {
        "w1": params["w1"].astype(wd),                                        # (S, H)
        "w26": jnp.stack([params[f"w{i}"] for i in range(2, 7)]).astype(wd),  # (5, H, H)
        "w_head": jnp.stack([params["w_mu"], params["w_std"]]).astype(wd),    # (2, H, A)
        "b_head": jnp.stack([params["b_mu"], params["b_std"]]),               # (2, 1, A) f32
        "gb": jnp.concatenate([params["bn_gamma"], params["bn_beta"]], 0),    # (2, H)   f32
    }


def policy_net_forward(x, eps, packed, *, action_bound):
    """x: (B, state_dim) f32; eps: (B, action_dim) f32 standard-normal noise."""
    B = x.shape[0]
    action_dim = eps.shape[1]
    assert action_dim + 1 <= OUT_LANES

    inputs = (x, eps, packed["w1"], packed["w26"],
              packed["w_head"], packed["b_head"], packed["gb"])
    vmem = lambda: pl.BlockSpec(memory_space=pltpu.MemorySpace.VMEM)

    # Gridless call: every operand is tiny and fully VMEM-resident; the whole
    # batch must live in one invocation because training-mode BN couples it.
    # TODO(synk): for v7x megacore (2 TCs) or very large batch/hidden_dim,
    # compute BN statistics in a preamble pass so the batch axis can be
    # gridded with dimension_semantics=("parallel",) and/or grid over the
    # stacked-layer axis with bf16 weights to stay under the 64 MiB VMEM.
    out = pl.pallas_call(
        functools.partial(policy_net_kernel, float(action_bound), action_dim),
        out_shape=jax.ShapeDtypeStruct((B, OUT_LANES), jnp.float32),
        in_specs=[vmem() for _ in inputs],
        out_specs=vmem(),
    )(*inputs)

    action = out[:, :action_dim]
    log_prob = out[:, action_dim:action_dim + 1]
    return action, log_prob


def init_params(key, state_dim, hidden_dim, action_dim):
    """Deterministic synthetic parameters (xavier-like weights, small biases).

    Linear weights are stored transposed: (in_features, out_features).
    Hidden-layer biases are generated for module parity but are not used by
    the kernel (BN cancels them)."""
    dims = [
        ("w1", state_dim, hidden_dim), ("w2", hidden_dim, hidden_dim),
        ("w3", hidden_dim, hidden_dim), ("w4", hidden_dim, hidden_dim),
        ("w5", hidden_dim, hidden_dim), ("w6", hidden_dim, hidden_dim),
        ("w_mu", hidden_dim, action_dim), ("w_std", hidden_dim, action_dim),
    ]
    params = {}
    for name, fan_in, fan_out in dims:
        key, kw, kb = jax.random.split(key, 3)
        limit = math.sqrt(6.0 / (fan_in + fan_out))
        params[name] = jax.random.uniform(
            kw, (fan_in, fan_out), jnp.float32, -limit, limit)
        bname = "b" + name[1:]
        params[bname] = 0.1 * jax.random.normal(kb, (1, fan_out), jnp.float32)
    # shared BatchNorm1d(hidden_dim): gamma=1, beta=0 (default init)
    params["bn_gamma"] = jnp.ones((1, hidden_dim), jnp.float32)
    params["bn_beta"] = jnp.zeros((1, hidden_dim), jnp.float32)
    # policy_mean / policy_std exist in the module but are unused in forward().
    return params


if __name__ == "__main__":
    batch, state_dim, hidden_dim, action_dim = 8, 16, 32, 4
    action_bound = 2.0

    key = jax.random.PRNGKey(0)
    key, kx, keps, kp = jax.random.split(key, 4)

    x = jax.random.normal(kx, (batch, state_dim), jnp.float32)
    eps = jax.random.normal(keps, (batch, action_dim), jnp.float32)
    params = init_params(kp, state_dim, hidden_dim, action_dim)
    packed = pack_params(params)

    fwd = jax.jit(policy_net_forward, static_argnames=("action_bound",))
    action, log_prob = fwd(x, eps, packed, action_bound=action_bound)
    action = jax.block_until_ready(action)
    log_prob = jax.block_until_ready(log_prob)

    assert action.shape == (batch, action_dim)
    assert log_prob.shape == (batch, 1)
    assert bool(jnp.all(jnp.isfinite(action))) and bool(jnp.all(jnp.isfinite(log_prob)))
    assert bool(jnp.all(jnp.abs(action) <= action_bound + 1e-5))

    print("KERNEL_OK")
</pallas_src>

<mosaic_0001>
module attributes {stable_mosaic.version = 11 : i64} {
  func.func @policy_net_kernel(%arg0: memref<8x16xf32, #tpu.memory_space<vmem>>, %arg1: memref<8x4xf32, #tpu.memory_space<vmem>>, %arg2: memref<16x32xbf16, #tpu.memory_space<vmem>>, %arg3: memref<5x32x32xbf16, #tpu.memory_space<vmem>>, %arg4: memref<2x32x4xbf16, #tpu.memory_space<vmem>>, %arg5: memref<2x1x4xf32, #tpu.memory_space<vmem>>, %arg6: memref<2x32xf32, #tpu.memory_space<vmem>>, %arg7: memref<8x128xf32, #tpu.memory_space<vmem>>) attributes {dimension_semantics = [], scalar_prefetch = 0 : i64, scratch_operands = 0 : i64, tpu.core_type = #tpu.core_type<tc>} {
    %c0 = arith.constant 0 : index
    %c0_0 = arith.constant 0 : index
    %0 = vector.load %arg0[%c0, %c0_0] : memref<8x16xf32, #tpu.memory_space<vmem>>, vector<8x16xf32>
    %c0_1 = arith.constant 0 : index
    %c0_2 = arith.constant 0 : index
    %1 = vector.load %arg6[%c0_1, %c0_2] : memref<2x32xf32, #tpu.memory_space<vmem>>, vector<1x32xf32>
    %c1 = arith.constant 1 : index
    %c0_3 = arith.constant 0 : index
    %2 = vector.load %arg6[%c1, %c0_3] : memref<2x32xf32, #tpu.memory_space<vmem>>, vector<1x32xf32>
    %c0_4 = arith.constant 0 : index
    %c0_5 = arith.constant 0 : index
    %3 = vector.load %arg2[%c0_4, %c0_5] : memref<16x32xbf16, #tpu.memory_space<vmem>>, vector<16x32xbf16>
    %4 = arith.truncf %0 : vector<8x16xf32> to vector<8x16xbf16>
    %cst = arith.constant dense<0.000000e+00> : vector<8x32xf32>
    %5 = tpu.matmul %4, %3, %cst {dimension_numbers = #tpu.dot_dimension_numbers<[1], [0], [0], [1], [0, 0, 1, 1], [], []>} : vector<8x16xbf16>, vector<16x32xbf16>, vector<8x32xf32> -> vector<8x32xf32>
    %6 = arith.mulf %5, %5 : vector<8x32xf32>
    %7 = tpu.concatenate %5, %6 in 1 : vector<8x32xf32>, vector<8x32xf32> -> vector<8x64xf32>
    %cst_6 = arith.constant dense<0.000000e+00> : vector<64xf32>
    %8 = vector.multi_reduction <add>, %7, %cst_6 [0] : vector<8x64xf32> to vector<64xf32>
    %9 = vector.shape_cast %8 : vector<64xf32> to vector<1x64xf32>
    %cst_7 = arith.constant 1.250000e-01 : f32
    %10 = vector.broadcast %cst_7 : f32 to vector<1x64xf32>
    %11 = arith.mulf %9, %10 : vector<1x64xf32>
    %12 = vector.extract_strided_slice %11 {offsets = [0, 0], sizes = [1, 32], strides = [1, 1]} : vector<1x64xf32> to vector<1x32xf32>
    %13 = vector.extract_strided_slice %11 {offsets = [0, 32], sizes = [1, 32], strides = [1, 1]} : vector<1x64xf32> to vector<1x32xf32>
    %14 = arith.mulf %12, %12 : vector<1x32xf32>
    %15 = arith.subf %13, %14 : vector<1x32xf32>
    %cst_8 = arith.constant 0.000000e+00 : f32
    %16 = vector.broadcast %cst_8 : f32 to vector<1x32xf32>
    %17 = arith.maximumf %15, %16 : vector<1x32xf32>
    %cst_9 = arith.constant 9.99999974E-6 : f32
    %18 = vector.broadcast %cst_9 : f32 to vector<1x32xf32>
    %19 = arith.addf %17, %18 : vector<1x32xf32>
    %20 = math.rsqrt %19 : vector<1x32xf32>
    %21 = arith.mulf %1, %20 : vector<1x32xf32>
    %22 = arith.mulf %12, %21 : vector<1x32xf32>
    %23 = arith.subf %2, %22 : vector<1x32xf32>
    %24 = vector.broadcast %21 : vector<1x32xf32> to vector<8x32xf32>
    %25 = arith.mulf %5, %24 : vector<8x32xf32>
    %26 = vector.broadcast %23 : vector<1x32xf32> to vector<8x32xf32>
    %27 = arith.addf %25, %26 : vector<8x32xf32>
    %cst_10 = arith.constant 0.000000e+00 : f32
    %28 = vector.broadcast %cst_10 : f32 to vector<8x32xf32>
    %29 = arith.maximumf %27, %28 : vector<8x32xf32>
    %c0_11 = arith.constant 0 : index
    %c0_12 = arith.constant 0 : index
    %c0_13 = arith.constant 0 : index
    %30 = vector.load %arg3[%c0_11, %c0_12, %c0_13] : memref<5x32x32xbf16, #tpu.memory_space<vmem>>, vector<1x32x32xbf16>
    %31 = vector.shape_cast %30 : vector<1x32x32xbf16> to vector<32x32xbf16>
    %32 = arith.truncf %29 : vector<8x32xf32> to vector<8x32xbf16>
    %cst_14 = arith.constant dense<0.000000e+00> : vector<8x32xf32>
    %33 = tpu.matmul %32, %31, %cst_14 {dimension_numbers = #tpu.dot_dimension_numbers<[1], [0], [0], [1], [0, 0, 1, 1], [], []>} : vector<8x32xbf16>, vector<32x32xbf16>, vector<8x32xf32> -> vector<8x32xf32>
    %34 = arith.mulf %33, %33 : vector<8x32xf32>
    %35 = tpu.concatenate %33, %34 in 1 : vector<8x32xf32>, vector<8x32xf32> -> vector<8x64xf32>
    %cst_15 = arith.constant dense<0.000000e+00> : vector<64xf32>
    %36 = vector.multi_reduction <add>, %35, %cst_15 [0] : vector<8x64xf32> to vector<64xf32>
    %37 = vector.shape_cast %36 : vector<64xf32> to vector<1x64xf32>
    %cst_16 = arith.constant 1.250000e-01 : f32
    %38 = vector.broadcast %cst_16 : f32 to vector<1x64xf32>
    %39 = arith.mulf %37, %38 : vector<1x64xf32>
    %40 = vector.extract_strided_slice %39 {offsets = [0, 0], sizes = [1, 32], strides = [1, 1]} : vector<1x64xf32> to vector<1x32xf32>
    %41 = vector.extract_strided_slice %39 {offsets = [0, 32], sizes = [1, 32], strides = [1, 1]} : vector<1x64xf32> to vector<1x32xf32>
    %42 = arith.mulf %40, %40 : vector<1x32xf32>
    %43 = arith.subf %41, %42 : vector<1x32xf32>
    %cst_17 = arith.constant 0.000000e+00 : f32
    %44 = vector.broadcast %cst_17 : f32 to vector<1x32xf32>
    %45 = arith.maximumf %43, %44 : vector<1x32xf32>
    %cst_18 = arith.constant 9.99999974E-6 : f32
    %46 = vector.broadcast %cst_18 : f32 to vector<1x32xf32>
    %47 = arith.addf %45, %46 : vector<1x32xf32>
    %48 = math.rsqrt %47 : vector<1x32xf32>
    %49 = arith.mulf %1, %48 : vector<1x32xf32>
    %50 = arith.mulf %40, %49 : vector<1x32xf32>
    %51 = arith.subf %2, %50 : vector<1x32xf32>
    %52 = vector.broadcast %49 : vector<1x32xf32> to vector<8x32xf32>
    %53 = arith.mulf %33, %52 : vector<8x32xf32>
    %54 = vector.broadcast %51 : vector<1x32xf32> to vector<8x32xf32>
    %55 = arith.addf %53, %54 : vector<8x32xf32>
    %cst_19 = arith.constant 0.000000e+00 : f32
    %56 = vector.broadcast %cst_19 : f32 to vector<8x32xf32>
    %57 = arith.maximumf %55, %56 : vector<8x32xf32>
    %c1_20 = arith.constant 1 : index
    %c0_21 = arith.constant 0 : index
    %c0_22 = arith.constant 0 : index
    %58 = vector.load %arg3[%c1_20, %c0_21, %c0_22] : memref<5x32x32xbf16, #tpu.memory_space<vmem>>, vector<1x32x32xbf16>
    %59 = vector.shape_cast %58 : vector<1x32x32xbf16> to vector<32x32xbf16>
    %60 = arith.truncf %57 : vector<8x32xf32> to vector<8x32xbf16>
    %cst_23 = arith.constant dense<0.000000e+00> : vector<8x32xf32>
    %61 = tpu.matmul %60, %59, %cst_23 {dimension_numbers = #tpu.dot_dimension_numbers<[1], [0], [0], [1], [0, 0, 1, 1], [], []>} : vector<8x32xbf16>, vector<32x32xbf16>, vector<8x32xf32> -> vector<8x32xf32>
    %62 = arith.mulf %61, %61 : vector<8x32xf32>
    %63 = tpu.concatenate %61, %62 in 1 : vector<8x32xf32>, vector<8x32xf32> -> vector<8x64xf32>
    %cst_24 = arith.constant dense<0.000000e+00> : vector<64xf32>
    %64 = vector.multi_reduction <add>, %63, %cst_24 [0] : vector<8x64xf32> to vector<64xf32>
    %65 = vector.shape_cast %64 : vector<64xf32> to vector<1x64xf32>
    %cst_25 = arith.constant 1.250000e-01 : f32
    %66 = vector.broadcast %cst_25 : f32 to vector<1x64xf32>
    %67 = arith.mulf %65, %66 : vector<1x64xf32>
    %68 = vector.extract_strided_slice %67 {offsets = [0, 0], sizes = [1, 32], strides = [1, 1]} : vector<1x64xf32> to vector<1x32xf32>
    %69 = vector.extract_strided_slice %67 {offsets = [0, 32], sizes = [1, 32], strides = [1, 1]} : vector<1x64xf32> to vector<1x32xf32>
    %70 = arith.mulf %68, %68 : vector<1x32xf32>
    %71 = arith.subf %69, %70 : vector<1x32xf32>
    %cst_26 = arith.constant 0.000000e+00 : f32
    %72 = vector.broadcast %cst_26 : f32 to vector<1x32xf32>
    %73 = arith.maximumf %71, %72 : vector<1x32xf32>
    %cst_27 = arith.constant 9.99999974E-6 : f32
    %74 = vector.broadcast %cst_27 : f32 to vector<1x32xf32>
    %75 = arith.addf %73, %74 : vector<1x32xf32>
    %76 = math.rsqrt %75 : vector<1x32xf32>
    %77 = arith.mulf %1, %76 : vector<1x32xf32>
    %78 = arith.mulf %68, %77 : vector<1x32xf32>
    %79 = arith.subf %2, %78 : vector<1x32xf32>
    %80 = vector.broadcast %77 : vector<1x32xf32> to vector<8x32xf32>
    %81 = arith.mulf %61, %80 : vector<8x32xf32>
    %82 = vector.broadcast %79 : vector<1x32xf32> to vector<8x32xf32>
    %83 = arith.addf %81, %82 : vector<8x32xf32>
    %cst_28 = arith.constant 0.000000e+00 : f32
    %84 = vector.broadcast %cst_28 : f32 to vector<8x32xf32>
    %85 = arith.maximumf %83, %84 : vector<8x32xf32>
    %c2 = arith.constant 2 : index
    %c0_29 = arith.constant 0 : index
    %c0_30 = arith.constant 0 : index
    %86 = vector.load %arg3[%c2, %c0_29, %c0_30] : memref<5x32x32xbf16, #tpu.memory_space<vmem>>, vector<1x32x32xbf16>
    %87 = vector.shape_cast %86 : vector<1x32x32xbf16> to vector<32x32xbf16>
    %88 = arith.truncf %85 : vector<8x32xf32> to vector<8x32xbf16>
    %cst_31 = arith.constant dense<0.000000e+00> : vector<8x32xf32>
    %89 = tpu.matmul %88, %87, %cst_31 {dimension_numbers = #tpu.dot_dimension_numbers<[1], [0], [0], [1], [0, 0, 1, 1], [], []>} : vector<8x32xbf16>, vector<32x32xbf16>, vector<8x32xf32> -> vector<8x32xf32>
    %90 = arith.mulf %89, %89 : vector<8x32xf32>
    %91 = tpu.concatenate %89, %90 in 1 : vector<8x32xf32>, vector<8x32xf32> -> vector<8x64xf32>
    %cst_32 = arith.constant dense<0.000000e+00> : vector<64xf32>
    %92 = vector.multi_reduction <add>, %91, %cst_32 [0] : vector<8x64xf32> to vector<64xf32>
    %93 = vector.shape_cast %92 : vector<64xf32> to vector<1x64xf32>
    %cst_33 = arith.constant 1.250000e-01 : f32
    %94 = vector.broadcast %cst_33 : f32 to vector<1x64xf32>
    %95 = arith.mulf %93, %94 : vector<1x64xf32>
    %96 = vector.extract_strided_slice %95 {offsets = [0, 0], sizes = [1, 32], strides = [1, 1]} : vector<1x64xf32> to vector<1x32xf32>
    %97 = vector.extract_strided_slice %95 {offsets = [0, 32], sizes = [1, 32], strides = [1, 1]} : vector<1x64xf32> to vector<1x32xf32>
    %98 = arith.mulf %96, %96 : vector<1x32xf32>
    %99 = arith.subf %97, %98 : vector<1x32xf32>
    %cst_34 = arith.constant 0.000000e+00 : f32
    %100 = vector.broadcast %cst_34 : f32 to vector<1x32xf32>
    %101 = arith.maximumf %99, %100 : vector<1x32xf32>
    %cst_35 = arith.constant 9.99999974E-6 : f32
    %102 = vector.broadcast %cst_35 : f32 to vector<1x32xf32>
    %103 = arith.addf %101, %102 : vector<1x32xf32>
    %104 = math.rsqrt %103 : vector<1x32xf32>
    %105 = arith.mulf %1, %104 : vector<1x32xf32>
    %106 = arith.mulf %96, %105 : vector<1x32xf32>
    %107 = arith.subf %2, %106 : vector<1x32xf32>
    %108 = vector.broadcast %105 : vector<1x32xf32> to vector<8x32xf32>
    %109 = arith.mulf %89, %108 : vector<8x32xf32>
    %110 = vector.broadcast %107 : vector<1x32xf32> to vector<8x32xf32>
    %111 = arith.addf %109, %110 : vector<8x32xf32>
    %cst_36 = arith.constant 0.000000e+00 : f32
    %112 = vector.broadcast %cst_36 : f32 to vector<8x32xf32>
    %113 = arith.maximumf %111, %112 : vector<8x32xf32>
    %c3 = arith.constant 3 : index
    %c0_37 = arith.constant 0 : index
    %c0_38 = arith.constant 0 : index
    %114 = vector.load %arg3[%c3, %c0_37, %c0_38] : memref<5x32x32xbf16, #tpu.memory_space<vmem>>, vector<1x32x32xbf16>
    %115 = vector.shape_cast %114 : vector<1x32x32xbf16> to vector<32x32xbf16>
    %116 = arith.truncf %113 : vector<8x32xf32> to vector<8x32xbf16>
    %cst_39 = arith.constant dense<0.000000e+00> : vector<8x32xf32>
    %117 = tpu.matmul %116, %115, %cst_39 {dimension_numbers = #tpu.dot_dimension_numbers<[1], [0], [0], [1], [0, 0, 1, 1], [], []>} : vector<8x32xbf16>, vector<32x32xbf16>, vector<8x32xf32> -> vector<8x32xf32>
    %118 = arith.mulf %117, %117 : vector<8x32xf32>
    %119 = tpu.concatenate %117, %118 in 1 : vector<8x32xf32>, vector<8x32xf32> -> vector<8x64xf32>
    %cst_40 = arith.constant dense<0.000000e+00> : vector<64xf32>
    %120 = vector.multi_reduction <add>, %119, %cst_40 [0] : vector<8x64xf32> to vector<64xf32>
    %121 = vector.shape_cast %120 : vector<64xf32> to vector<1x64xf32>
    %cst_41 = arith.constant 1.250000e-01 : f32
    %122 = vector.broadcast %cst_41 : f32 to vector<1x64xf32>
    %123 = arith.mulf %121, %122 : vector<1x64xf32>
    %124 = vector.extract_strided_slice %123 {offsets = [0, 0], sizes = [1, 32], strides = [1, 1]} : vector<1x64xf32> to vector<1x32xf32>
    %125 = vector.extract_strided_slice %123 {offsets = [0, 32], sizes = [1, 32], strides = [1, 1]} : vector<1x64xf32> to vector<1x32xf32>
    %126 = arith.mulf %124, %124 : vector<1x32xf32>
    %127 = arith.subf %125, %126 : vector<1x32xf32>
    %cst_42 = arith.constant 0.000000e+00 : f32
    %128 = vector.broadcast %cst_42 : f32 to vector<1x32xf32>
    %129 = arith.maximumf %127, %128 : vector<1x32xf32>
    %cst_43 = arith.constant 9.99999974E-6 : f32
    %130 = vector.broadcast %cst_43 : f32 to vector<1x32xf32>
    %131 = arith.addf %129, %130 : vector<1x32xf32>
    %132 = math.rsqrt %131 : vector<1x32xf32>
    %133 = arith.mulf %1, %132 : vector<1x32xf32>
    %134 = arith.mulf %124, %133 : vector<1x32xf32>
    %135 = arith.subf %2, %134 : vector<1x32xf32>
    %136 = vector.broadcast %133 : vector<1x32xf32> to vector<8x32xf32>
    %137 = arith.mulf %117, %136 : vector<8x32xf32>
    %138 = vector.broadcast %135 : vector<1x32xf32> to vector<8x32xf32>
    %139 = arith.addf %137, %138 : vector<8x32xf32>
    %cst_44 = arith.constant 0.000000e+00 : f32
    %140 = vector.broadcast %cst_44 : f32 to vector<8x32xf32>
    %141 = arith.maximumf %139, %140 : vector<8x32xf32>
    %c4 = arith.constant 4 : index
    %c0_45 = arith.constant 0 : index
    %c0_46 = arith.constant 0 : index
    %142 = vector.load %arg3[%c4, %c0_45, %c0_46] : memref<5x32x32xbf16, #tpu.memory_space<vmem>>, vector<1x32x32xbf16>
    %143 = vector.shape_cast %142 : vector<1x32x32xbf16> to vector<32x32xbf16>
    %144 = arith.truncf %141 : vector<8x32xf32> to vector<8x32xbf16>
    %cst_47 = arith.constant dense<0.000000e+00> : vector<8x32xf32>
    %145 = tpu.matmul %144, %143, %cst_47 {dimension_numbers = #tpu.dot_dimension_numbers<[1], [0], [0], [1], [0, 0, 1, 1], [], []>} : vector<8x32xbf16>, vector<32x32xbf16>, vector<8x32xf32> -> vector<8x32xf32>
    %146 = arith.mulf %145, %145 : vector<8x32xf32>
    %147 = tpu.concatenate %145, %146 in 1 : vector<8x32xf32>, vector<8x32xf32> -> vector<8x64xf32>
    %cst_48 = arith.constant dense<0.000000e+00> : vector<64xf32>
    %148 = vector.multi_reduction <add>, %147, %cst_48 [0] : vector<8x64xf32> to vector<64xf32>
    %149 = vector.shape_cast %148 : vector<64xf32> to vector<1x64xf32>
    %cst_49 = arith.constant 1.250000e-01 : f32
    %150 = vector.broadcast %cst_49 : f32 to vector<1x64xf32>
    %151 = arith.mulf %149, %150 : vector<1x64xf32>
    %152 = vector.extract_strided_slice %151 {offsets = [0, 0], sizes = [1, 32], strides = [1, 1]} : vector<1x64xf32> to vector<1x32xf32>
    %153 = vector.extract_strided_slice %151 {offsets = [0, 32], sizes = [1, 32], strides = [1, 1]} : vector<1x64xf32> to vector<1x32xf32>
    %154 = arith.mulf %152, %152 : vector<1x32xf32>
    %155 = arith.subf %153, %154 : vector<1x32xf32>
    %cst_50 = arith.constant 0.000000e+00 : f32
    %156 = vector.broadcast %cst_50 : f32 to vector<1x32xf32>
    %157 = arith.maximumf %155, %156 : vector<1x32xf32>
    %cst_51 = arith.constant 9.99999974E-6 : f32
    %158 = vector.broadcast %cst_51 : f32 to vector<1x32xf32>
    %159 = arith.addf %157, %158 : vector<1x32xf32>
    %160 = math.rsqrt %159 : vector<1x32xf32>
    %161 = arith.mulf %1, %160 : vector<1x32xf32>
    %162 = arith.mulf %152, %161 : vector<1x32xf32>
    %163 = arith.subf %2, %162 : vector<1x32xf32>
    %164 = vector.broadcast %161 : vector<1x32xf32> to vector<8x32xf32>
    %165 = arith.mulf %145, %164 : vector<8x32xf32>
    %166 = vector.broadcast %163 : vector<1x32xf32> to vector<8x32xf32>
    %167 = arith.addf %165, %166 : vector<8x32xf32>
    %cst_52 = arith.constant 0.000000e+00 : f32
    %168 = vector.broadcast %cst_52 : f32 to vector<8x32xf32>
    %169 = arith.maximumf %167, %168 : vector<8x32xf32>
    %c0_53 = arith.constant 0 : index
    %c0_54 = arith.constant 0 : index
    %c0_55 = arith.constant 0 : index
    %170 = vector.load %arg4[%c0_53, %c0_54, %c0_55] : memref<2x32x4xbf16, #tpu.memory_space<vmem>>, vector<1x32x4xbf16>
    %171 = vector.shape_cast %170 : vector<1x32x4xbf16> to vector<32x4xbf16>
    %172 = arith.truncf %169 : vector<8x32xf32> to vector<8x32xbf16>
    %cst_56 = arith.constant dense<0.000000e+00> : vector<8x4xf32>
    %173 = tpu.matmul %172, %171, %cst_56 {dimension_numbers = #tpu.dot_dimension_numbers<[1], [0], [0], [1], [0, 0, 1, 1], [], []>} : vector<8x32xbf16>, vector<32x4xbf16>, vector<8x4xf32> -> vector<8x4xf32>
    %c0_57 = arith.constant 0 : index
    %c0_58 = arith.constant 0 : index
    %c0_59 = arith.constant 0 : index
    %174 = vector.load %arg5[%c0_57, %c0_58, %c0_59] : memref<2x1x4xf32, #tpu.memory_space<vmem>>, vector<1x1x4xf32>
    %175 = vector.shape_cast %174 : vector<1x1x4xf32> to vector<1x4xf32>
    %176 = vector.broadcast %175 : vector<1x4xf32> to vector<8x4xf32>
    %177 = arith.addf %173, %176 : vector<8x4xf32>
    %c1_60 = arith.constant 1 : index
    %c0_61 = arith.constant 0 : index
    %c0_62 = arith.constant 0 : index
    %178 = vector.load %arg4[%c1_60, %c0_61, %c0_62] : memref<2x32x4xbf16, #tpu.memory_space<vmem>>, vector<1x32x4xbf16>
    %179 = vector.shape_cast %178 : vector<1x32x4xbf16> to vector<32x4xbf16>
    %180 = arith.truncf %169 : vector<8x32xf32> to vector<8x32xbf16>
    %cst_63 = arith.constant dense<0.000000e+00> : vector<8x4xf32>
    %181 = tpu.matmul %180, %179, %cst_63 {dimension_numbers = #tpu.dot_dimension_numbers<[1], [0], [0], [1], [0, 0, 1, 1], [], []>} : vector<8x32xbf16>, vector<32x4xbf16>, vector<8x4xf32> -> vector<8x4xf32>
    %c1_64 = arith.constant 1 : index
    %c0_65 = arith.constant 0 : index
    %c0_66 = arith.constant 0 : index
    %182 = vector.load %arg5[%c1_64, %c0_65, %c0_66] : memref<2x1x4xf32, #tpu.memory_space<vmem>>, vector<1x1x4xf32>
    %183 = vector.shape_cast %182 : vector<1x1x4xf32> to vector<1x4xf32>
    %184 = vector.broadcast %183 : vector<1x4xf32> to vector<8x4xf32>
    %185 = arith.addf %181, %184 : vector<8x4xf32>
    %cst_67 = arith.constant 0.000000e+00 : f32
    %186 = vector.broadcast %cst_67 : f32 to vector<8x4xf32>
    %187 = arith.maximumf %185, %186 : vector<8x4xf32>
    %188 = math.absf %185 : vector<8x4xf32>
    %cst_68 = arith.constant 0.000000e+00 : f32
    %189 = vector.broadcast %cst_68 : f32 to vector<8x4xf32>
    %190 = arith.subf %189, %188 : vector<8x4xf32>
    %191 = math.exp %190 : vector<8x4xf32>
    %192 = math.log1p %191 : vector<8x4xf32>
    %193 = arith.addf %187, %192 : vector<8x4xf32>
    %c0_69 = arith.constant 0 : index
    %c0_70 = arith.constant 0 : index
    %194 = vector.load %arg1[%c0_69, %c0_70] : memref<8x4xf32, #tpu.memory_space<vmem>>, vector<8x4xf32>
    %195 = arith.mulf %193, %194 : vector<8x4xf32>
    %196 = arith.addf %177, %195 : vector<8x4xf32>
    %cst_71 = arith.constant -5.000000e-01 : f32
    %197 = vector.broadcast %cst_71 : f32 to vector<8x4xf32>
    %198 = arith.mulf %197, %194 : vector<8x4xf32>
    %199 = arith.mulf %198, %194 : vector<8x4xf32>
    %200 = math.log %193 : vector<8x4xf32>
    %201 = arith.subf %199, %200 : vector<8x4xf32>
    %cst_72 = arith.constant 0.918938517 : f32
    %202 = vector.broadcast %cst_72 : f32 to vector<8x4xf32>
    %203 = arith.subf %201, %202 : vector<8x4xf32>
    %204 = math.tanh %196 : vector<8x4xf32>
    %205 = math.tanh %204 : vector<8x4xf32>
    %206 = arith.mulf %205, %205 : vector<8x4xf32>
    %cst_73 = arith.constant 1.000000e+00 : f32
    %207 = vector.broadcast %cst_73 : f32 to vector<8x4xf32>
    %208 = arith.subf %207, %206 : vector<8x4xf32>
    %cst_74 = arith.constant 1.000000e-07 : f32
    %209 = vector.broadcast %cst_74 : f32 to vector<8x4xf32>
    %210 = arith.addf %208, %209 : vector<8x4xf32>
    %211 = math.log %210 : vector<8x4xf32>
    %212 = arith.subf %203, %211 : vector<8x4xf32>
    %cst_75 = arith.constant 2.000000e+00 : f32
    %213 = vector.broadcast %cst_75 : f32 to vector<8x4xf32>
    %214 = arith.mulf %204, %213 : vector<8x4xf32>
    %cst_76 = arith.constant dense<0.000000e+00> : vector<8xf32>
    %215 = vector.multi_reduction <add>, %212, %cst_76 [1] : vector<8x4xf32> to vector<8xf32>
    %216 = vector.shape_cast %215 : vector<8xf32> to vector<8x1xf32>
    %217 = tpu.concatenate %214, %216 in 1 : vector<8x4xf32>, vector<8x1xf32> -> vector<8x5xf32>
    %cst_77 = arith.constant 0.000000e+00 : f32
    %218 = vector.broadcast %cst_77 : f32 to vector<8x123xf32>
    %219 = tpu.concatenate %217, %218 in 1 : vector<8x5xf32>, vector<8x123xf32> -> vector<8x128xf32>
    %c0_78 = arith.constant 0 : index
    %c0_79 = arith.constant 0 : index
    %220 = vector.load %arg7[%c0_78, %c0_79] : memref<8x128xf32, #tpu.memory_space<vmem>>, vector<8x128xf32>
    tpu.vector_store %arg7[%c0_78, %c0_79], %219 {strides = array<i32>} : memref<8x128xf32, #tpu.memory_space<vmem>>, vector<8x128xf32>,
    return
  }
}

</mosaic_0001>

<bundles_post_ra>
// kernel: policy_net_forward.1
= control target key start
LH: loop header
LB: loop body
LE: loop exit
PB: predicated region body
PF: predicated region fallthrough
CT: control target
= control target key end

     0   :  { %12 = vsyncpa [#allocation3], 0  ;;  %s1013_s24 = smov [#allocation2]   ;;  %s1206_s0 = inlined_call_operand.vmem [shape: f32[8,16], index: 0, kind: input, shape index: {}]   ;;  %s1207_s1 = inlined_call_operand.vmem [shape: f32[8,4], index: 1, kind: input, shape index: {}]   ;;  %s1208_s2 = inlined_call_operand.vmem [shape: bf16[16,32], index: 2, kind: input, shape index: {}]   ;;  %s1209_s3 = inlined_call_operand.hbm [shape: bf16[5,32,32], index: 3, kind: input, shape index: {}]   ;;  %s1210_s4 = inlined_call_operand.vmem [shape: bf16[2,32,4], index: 4, kind: input, shape index: {}]   ;;  %s1211_s5 = inlined_call_operand.vmem [shape: f32[2,1,4], index: 5, kind: input, shape index: {}]   ;;  %s1212_s6 = inlined_call_operand.vmem [shape: f32[2,32], index: 6, kind: input, shape index: {}]   ;;  %s1213_s7 = inlined_call_operand.vmem [shape: f32[8,128], index: 7, kind: output, shape index: {}]  }
   0x1   :  { %s24_s25 = sshll.u32 %s1013_s24, 4  ;;  %s989_s28 = scalar_lea.hbm %s1209_s3, 1280  ;;  %s25_s25 = int_to_ptr.vmem [resolvable:$true] %s24_s25 }
   0x2   :  { %p990_p0 = scmp.ne.s32.totalorder %s1209_s3, %s989_s28  ;;  %p993_p1 = scmp.lt.u32.totalorder %s989_s28, %s1209_s3 }
   0x4   :  { %p995_p2 = pnand %p993_p1, %p990_p0 }
   0x6   :  { %998 = shalt.err (!%p995_p2)
}
   0x7   :  { %s999_s10 = scalar_lea.vmem %s25_s25, 1280  ;;  %p1004_p4 = scmp.lt.s32.totalorder %s25_s25, %s25_s25 }
   0x8   :  { %p1000_p3 = scmp.ne.s32.totalorder %s25_s25, %s999_s10  ;;  %p1005_p5 = scmp.lt.s32.totalorder %s999_s10, %s999_s10 }
   0xa   :  { %p1006_p6 = por %p1005_p5, %p1004_p4 }
   0xc   :  { %p1007_p7 = pnand %p1006_p6, %p1000_p3 }
   0xe   :  { %1010 = shalt.err (!%p1007_p7)
}
   0xf   :  { %s1014_s11 = smov 64   ;;  %s1015_s12 = smov 4  }
  0x10   :  { %30 = dma.hbm_to_vmem [thread:$0]  %s1209_s3, 1280, %s25_s25, [#allocation3], %s1014_s11, %s1014_s11, %s1015_s12  }
  0x11   :  { %1011 = dma.done.wait [#allocation3], 1280  }
  0x12   :  { %1012 = vsyncadd [#allocation3], 4294966016  ;;  %v1016_v0 = vmov 0.0   ;;  %vm1017_vm0 = vmmov 0   ;;  %v950_v1 = vld [vmem:[%s1208_s2] sm:$0xff]   ;;  %vm53_vm1 = vcmask 130048   ;;  %v129_v27 = vlaneseq }
  0x13   :  { %881 = vmatprep.subr.bf16.mxu0 %v1016_v0  ;;  %883 = vmatprep.mubr.msk.bf16.mxu0 %vm1017_vm0, %v1016_v0  ;;  %v41_v2 = vld [vmem:[%s1206_s0] sm:$0xff]  ;;  %s1018_s18 = smov 32   ;;  %vm102_vm2 = vcmask 261120   ;;  %vm104_vm3 = vcmask 523264   ;;  %v952_v25 = vld [vmem:[#allocation2 + $0x8] sm:$0xff]   ;;  %s1019_s0 = smov 96  }
  0x14   :  { %887 = vmatprep.subr.bf16.mxu1 %v1016_v0  ;;  %891 = vmatprep.mubr.msk.bf16.mxu1 %vm1017_vm0, %v1016_v0  ;;  %v46_v3 = vpack.c.bf16 %v41_v2, %v41_v2  ;;  %v951_v24 = vld [vmem:[#allocation2] sm:$0xff]   ;;  %v130_v28 = vshrl.u32 %v129_v27, 7  ;;  %v953_v62 = vld [vmem:[#allocation2 + $0x10] sm:$0xff]   ;;  %v954_v63 = vld [vmem:[#allocation2 + $0x18] sm:$0xff]   ;;  %vm814_vm5 = vcmask 31744   ;;  %vm819_vm6 = vcmask 39936  }
  0x15   :  { %882 = vmatpush3.bf16.msra.mxu0 %v950_v1  ;;  %888 = vmatpush3.bf16.msra.mxu1 %v951_v24  ;;  %v1097_v29 = vld [vmem:[%s1212_s6] sm:$0x1]  ;;  %v1105_v33 = vld [vmem:[%s1212_s6 + $0x1] sm:$0x1] }
  0x16   :  { %895 = vmatprep.subr.bf16.mxu0 %v1016_v0  ;;  %889 = vmatprep.subr.bf16.mxu1 %v1016_v0  ;;  %v1099_v30 = vsub.s32 0, %v130_v28 }
  0x18   :  { %884 = vmatmul.mubr.msk.bf16.vlgmr.msra.gmra.mrb[0].mxu0 %vm53_vm1, %v46_v3 }
  0x19   :  { %899 = vmatprep.mubr.msk.bf16.mxu0 %vm1017_vm0, %v1016_v0  ;;  %890 = vmatpush3.bf16.msra.mxu1 %v952_v25 }
  0x1a   :  { %903 = vmatprep.subr.bf16.mxu1 %v1016_v0  ;;  %896 = vmatpush3.bf16.msra.mxu0 %v953_v62 }
  0x1b   :  { %897 = vmatprep.subr.bf16.mxu0 %v1016_v0 }
  0x1e   :  { %898 = vmatpush3.bf16.msra.mxu0 %v954_v63 }
  0x1f   :  { %911 = vmatprep.subr.bf16.mxu0 %v1016_v0 }
  0xeb   :  { %v91_v4 = vpop.f32.mrb[0].mxu0 }
  0xec   :  { %v885_v5 = vpop.f32.mrb[1].mxu0  ;;  %v97_v6 = vmul.f32 %v91_v4, %v91_v4 }
  0xed   :  { %v94_v7 = vpop.f32.mrb[2].mxu0 }
  0xee   :  { %99 = vrot.lane.b32.xlu0 %v97_v6, %s1018_s18  ;;  %v886_v8 = vpop.f32.mrb[3].mxu0 }
 0x160   :  { %v100_v9 = vpop.permute.xlu0 %99 }
 0x161   :  { %v103_v10 = vsel %vm102_vm2, %v91_v4, %v100_v9 }
 0x162   :  { %v105_v11 = vsel %vm104_vm3, %v103_v10, 0.0 }
 0x163   :  { %v106_v12 = vrot.slane %v105_v11, 4 }
 0x165   :  { %v107_v13 = vadd.f32 %v106_v12, %v105_v11 }
 0x167   :  { %v108_v14 = vrot.slane %v107_v13, 2 }
 0x169   :  { %v109_v15 = vadd.f32 %v108_v14, %v107_v13 }
 0x16b   :  { %v110_v16 = vrot.slane %v109_v15, 1 }
 0x16d   :  { %v111_v17 = vadd.f32 %v110_v16, %v109_v15 }
 0x16f   :  { %v112_v18 = vmul.f32 0.125, %v111_v17 }
 0x171   :  { %v113_v19 = vmul.f32 %v112_v18, %v112_v18 }
 0x173   :  { %115 = vrot.lane.b32.xlu0 %v113_v19, %s1018_s18 }
 0x1e5   :  { %v116_v20 = vpop.permute.xlu0 %115 }
 0x1e6   :  { %v118_v21 = vsub.f32 %v112_v18, %v116_v20 }
 0x1e8   :  { %v119_v22 = vmax.f32 %v118_v21, 0.0 }
 0x1ea   :  { %v120_v23 = vadd.f32 1e-05, %v119_v22 }
 0x1ec   :  { %965 = vrsqrt.f32 %v120_v23 }
 0x1f6   :  { %v966_v26 = vpop.eup %965 }
 0x1f7   :  { %123 = vrot.lane.b32.xlu1 %v966_v26, %s1019_s0 }
 0x269   :  { %v124_v31 = vpop.permute.xlu1 %123 }
 0x26a   :  { %v126_v32 = vmul.f32 %v124_v31, %v1097_v29 }
 0x26c   :  { %v127_v34 = vmul.f32 %v126_v32, %v112_v18  ;;  %v132_v35 = vrot.slane %v126_v32, %v1099_v30 }
 0x26e   :  { %v128_v36 = vsub.f32 %v1105_v33, %v127_v34  ;;  %v133_v37 = vmul.f32 %v132_v35, %v91_v4  ;;  %v955_v35 = vld [vmem:[#allocation2 + $0x20] sm:$0xff]  }
 0x270   :  { %v137_v38 = vrot.slane %v128_v36, %v1099_v30  ;;  %v956_v36 = vld [vmem:[#allocation2 + $0x28] sm:$0xff]  }
 0x272   :  { %v138_v39 = vadd.f32 %v137_v38, %v133_v37 }
 0x274   :  { %v139_v40 = vmax.f32 %v138_v39, 0.0 }
 0x276   :  { %v144_v41 = vpack.c.bf16 %v139_v40, %v139_v40 }
 0x278   :  { %892 = vmatmul.mubr.msk.bf16.vlgmr.msra.gmra.mrb[0].mxu1 %vm102_vm2, %v144_v41 }
 0x279   :  { %907 = vmatprep.mubr.msk.bf16.mxu1 %vm1017_vm0, %v1016_v0  ;;  %904 = vmatpush3.bf16.msra.mxu1 %v955_v35 }
 0x27a   :  { %905 = vmatprep.subr.bf16.mxu1 %v1016_v0 }
 0x27d   :  { %906 = vmatpush3.bf16.msra.mxu1 %v956_v36 }
 0x27e   :  { %919 = vmatprep.subr.bf16.mxu1 %v1016_v0 }
 0x34b   :  { %v194_v42 = vpop.f32.mrb[0].mxu1 }
 0x34c   :  { %v200_v43 = vmul.f32 %v194_v42, %v194_v42  ;;  %v893_v44 = vpop.f32.mrb[1].mxu1 }
 0x34d   :  { %v197_v45 = vpop.f32.mrb[2].mxu1 }
 0x34e   :  { %202 = vrot.lane.b32.xlu1 %v200_v43, %s1018_s18  ;;  %v894_v46 = vpop.f32.mrb[3].mxu1 }
 0x3c0   :  { %v203_v47 = vpop.permute.xlu1 %202 }
 0x3c1   :  { %v205_v48 = vsel %vm102_vm2, %v194_v42, %v203_v47 }
 0x3c2   :  { %v206_v49 = vsel %vm104_vm3, %v205_v48, 0.0 }
 0x3c3   :  { %v207_v50 = vrot.slane %v206_v49, 4 }
 0x3c5   :  { %v208_v51 = vadd.f32 %v207_v50, %v206_v49 }
 0x3c7   :  { %v209_v52 = vrot.slane %v208_v51, 2 }
 0x3c9   :  { %v210_v53 = vadd.f32 %v209_v52, %v208_v51 }
 0x3cb   :  { %v211_v54 = vrot.slane %v210_v53, 1 }
 0x3cd   :  { %v212_v55 = vadd.f32 %v211_v54, %v210_v53 }
 0x3cf   :  { %v213_v56 = vmul.f32 0.125, %v212_v55 }
 0x3d1   :  { %v214_v57 = vmul.f32 %v213_v56, %v213_v56 }
 0x3d3   :  { %216 = vrot.lane.b32.xlu0 %v214_v57, %s1018_s18 }
 0x445   :  { %v217_v58 = vpop.permute.xlu0 %216 }
 0x446   :  { %v219_v59 = vsub.f32 %v213_v56, %v217_v58 }
 0x448   :  { %v220_v60 = vmax.f32 %v219_v59, 0.0 }
 0x44a   :  { %v221_v61 = vadd.f32 1e-05, %v220_v60 }
 0x44c   :  { %967 = vrsqrt.f32 %v221_v61 }
 0x456   :  { %v968_v1 = vpop.eup %967 }
 0x457   :  { %224 = vrot.lane.b32.xlu1 %v968_v1, %s1019_s0 }
 0x4c9   :  { %v225_v2 = vpop.permute.xlu1 %224 }
 0x4ca   :  { %v227_v3 = vmul.f32 %v225_v2, %v1097_v29 }
 0x4cc   :  { %v228_v4 = vmul.f32 %v227_v3, %v213_v56  ;;  %v233_v5 = vrot.slane %v227_v3, %v1099_v30 }
 0x4ce   :  { %v229_v6 = vsub.f32 %v1105_v33, %v228_v4  ;;  %v234_v7 = vmul.f32 %v233_v5, %v194_v42  ;;  %v957_v5 = vld [vmem:[#allocation2 + $0x30] sm:$0xff]  }
 0x4d0   :  { %v238_v8 = vrot.slane %v229_v6, %v1099_v30  ;;  %v958_v6 = vld [vmem:[#allocation2 + $0x38] sm:$0xff]  }
 0x4d2   :  { %v239_v9 = vadd.f32 %v238_v8, %v234_v7 }
 0x4d4   :  { %v240_v10 = vmax.f32 %v239_v9, 0.0 }
 0x4d6   :  { %v246_v11 = vpack.c.bf16 %v240_v10, %v240_v10 }
 0x4d8   :  { %900 = vmatmul.mubr.msk.bf16.vlgmr.msra.gmra.mrb[4].mxu0 %vm102_vm2, %v246_v11 }
 0x4d9   :  { %915 = vmatprep.mubr.msk.bf16.mxu0 %vm1017_vm0, %v1016_v0  ;;  %912 = vmatpush3.bf16.msra.mxu0 %v957_v5 }
 0x4da   :  { %913 = vmatprep.subr.bf16.mxu0 %v1016_v0 }
 0x4dd   :  { %914 = vmatpush3.bf16.msra.mxu0 %v958_v6 }
 0x4de   :  { %927 = vmatprep.subr.bf16.mxu0 %v1016_v0 }
 0x5ab   :  { %v296_v12 = vpop.f32.mrb[4].mxu0 }
 0x5ac   :  { %v302_v13 = vmul.f32 %v296_v12, %v296_v12  ;;  %v901_v14 = vpop.f32.mrb[5].mxu0 }
 0x5ad   :  { %v299_v15 = vpop.f32.mrb[6].mxu0 }
 0x5ae   :  { %304 = vrot.lane.b32.xlu0 %v302_v13, %s1018_s18  ;;  %v902_v16 = vpop.f32.mrb[7].mxu0 }
 0x620   :  { %v305_v17 = vpop.permute.xlu0 %304 }
 0x621   :  { %v307_v18 = vsel %vm102_vm2, %v296_v12, %v305_v17 }
 0x622   :  { %v308_v19 = vsel %vm104_vm3, %v307_v18, 0.0 }
 0x623   :  { %v309_v20 = vrot.slane %v308_v19, 4 }
 0x625   :  { %v310_v21 = vadd.f32 %v309_v20, %v308_v19 }
 0x627   :  { %v311_v22 = vrot.slane %v310_v21, 2 }
 0x629   :  { %v312_v23 = vadd.f32 %v311_v22, %v310_v21 }
 0x62b   :  { %v313_v24 = vrot.slane %v312_v23, 1 }
 0x62d   :  { %v314_v25 = vadd.f32 %v313_v24, %v312_v23 }
 0x62f   :  { %v315_v26 = vmul.f32 0.125, %v314_v25 }
 0x631   :  { %v316_v27 = vmul.f32 %v315_v26, %v315_v26 }
 0x633   :  { %318 = vrot.lane.b32.xlu1 %v316_v27, %s1018_s18 }
 0x6a5   :  { %v319_v28 = vpop.permute.xlu1 %318 }
 0x6a6   :  { %v321_v31 = vsub.f32 %v315_v26, %v319_v28 }
 0x6a8   :  { %v322_v32 = vmax.f32 %v321_v31, 0.0 }
 0x6aa   :  { %v323_v34 = vadd.f32 1e-05, %v322_v32 }
 0x6ac   :  { %969 = vrsqrt.f32 %v323_v34 }
 0x6b6   :  { %v970_v37 = vpop.eup %969 }
 0x6b7   :  { %326 = vrot.lane.b32.xlu0 %v970_v37, %s1019_s0 }
 0x729   :  { %v327_v38 = vpop.permute.xlu0 %326 }
 0x72a   :  { %v329_v39 = vmul.f32 %v327_v38, %v1097_v29 }
 0x72c   :  { %v330_v40 = vmul.f32 %v329_v39, %v315_v26  ;;  %v335_v41 = vrot.slane %v329_v39, %v1099_v30 }
 0x72e   :  { %v331_v42 = vsub.f32 %v1105_v33, %v330_v40  ;;  %v336_v43 = vmul.f32 %v335_v41, %v296_v12  ;;  %v959_v41 = vld [vmem:[#allocation2 + $0x40] sm:$0xff]  }
 0x730   :  { %v340_v44 = vrot.slane %v331_v42, %v1099_v30  ;;  %v960_v42 = vld [vmem:[#allocation2 + $0x48] sm:$0xff]  }
 0x732   :  { %v341_v45 = vadd.f32 %v340_v44, %v336_v43 }
 0x734   :  { %v342_v46 = vmax.f32 %v341_v45, 0.0 }
 0x736   :  { %v348_v47 = vpack.c.bf16 %v342_v46, %v342_v46 }
 0x738   :  { %908 = vmatmul.mubr.msk.bf16.vlgmr.msra.gmra.mrb[4].mxu1 %vm102_vm2, %v348_v47 }
 0x739   :  { %923 = vmatprep.mubr.msk.bf16.mxu1 %vm1017_vm0, %v1016_v0  ;;  %920 = vmatpush3.bf16.msra.mxu1 %v959_v41 }
 0x73a   :  { %921 = vmatprep.subr.bf16.mxu1 %v1016_v0 }
 0x73d   :  { %922 = vmatpush3.bf16.msra.mxu1 %v960_v42 }
 0x73e   :  { %935 = vmatprep.subr.bf16.mxu1 %v1016_v0 }
 0x80b   :  { %v398_v48 = vpop.f32.mrb[4].mxu1 }
 0x80c   :  { %v404_v49 = vmul.f32 %v398_v48, %v398_v48  ;;  %v909_v50 = vpop.f32.mrb[5].mxu1 }
 0x80d   :  { %v401_v51 = vpop.f32.mrb[6].mxu1 }
 0x80e   :  { %406 = vrot.lane.b32.xlu1 %v404_v49, %s1018_s18  ;;  %v910_v52 = vpop.f32.mrb[7].mxu1 }
 0x880   :  { %v407_v53 = vpop.permute.xlu1 %406 }
 0x881   :  { %v409_v54 = vsel %vm102_vm2, %v398_v48, %v407_v53 }
 0x882   :  { %v410_v55 = vsel %vm104_vm3, %v409_v54, 0.0 }
 0x883   :  { %v411_v56 = vrot.slane %v410_v55, 4 }
 0x885   :  { %v412_v57 = vadd.f32 %v411_v56, %v410_v55 }
 0x887   :  { %v413_v58 = vrot.slane %v412_v57, 2 }
 0x889   :  { %v414_v59 = vadd.f32 %v413_v58, %v412_v57 }
 0x88b   :  { %v415_v60 = vrot.slane %v414_v59, 1 }
 0x88d   :  { %v416_v61 = vadd.f32 %v415_v60, %v414_v59 }
 0x88f   :  { %v417_v62 = vmul.f32 0.125, %v416_v61 }
 0x891   :  { %v418_v63 = vmul.f32 %v417_v62, %v417_v62 }
 0x893   :  { %420 = vrot.lane.b32.xlu0 %v418_v63, %s1018_s18 }
 0x905   :  { %v421_v1 = vpop.permute.xlu0 %420 }
 0x906   :  { %v423_v2 = vsub.f32 %v417_v62, %v421_v1 }
 0x908   :  { %v424_v3 = vmax.f32 %v423_v2, 0.0 }
 0x90a   :  { %v425_v4 = vadd.f32 1e-05, %v424_v3 }
 0x90c   :  { %971 = vrsqrt.f32 %v425_v4 }
 0x916   :  { %v972_v7 = vpop.eup %971 }
 0x917   :  { %428 = vrot.lane.b32.xlu1 %v972_v7, %s1019_s0 }
 0x989   :  { %v429_v8 = vpop.permute.xlu1 %428 }
 0x98a   :  { %v431_v9 = vmul.f32 %v429_v8, %v1097_v29 }
 0x98c   :  { %v432_v10 = vmul.f32 %v431_v9, %v417_v62  ;;  %v437_v11 = vrot.slane %v431_v9, %v1099_v30 }
 0x98e   :  { %v433_v12 = vsub.f32 %v1105_v33, %v432_v10  ;;  %v438_v13 = vmul.f32 %v437_v11, %v398_v48  ;;  %v961_v11 = vld [vmem:[%s1210_s4 + $0x10] sm:$0xff]  }
 0x990   :  { %v442_v14 = vrot.slane %v433_v12, %v1099_v30  ;;  %v962_v12 = vld [vmem:[%s1210_s4] sm:$0xff]  }
 0x992   :  { %v443_v15 = vadd.f32 %v442_v14, %v438_v13  ;;  %v963_v13 = vld [vmem:[%s1210_s4 + $0x18] sm:$0xff]   ;;  %v964_v14 = vld [vmem:[%s1210_s4 + $0x8] sm:$0xff]  }
 0x994   :  { %v444_v16 = vmax.f32 %v443_v15, 0.0 }
 0x996   :  { %v450_v17 = vpack.c.bf16 %v444_v16, %v444_v16 }
 0x998   :  { %916 = vmatmul.mubr.msk.bf16.vlgmr.msra.gmra.mrb[8].mxu0 %vm102_vm2, %v450_v17 }
 0x999   :  { %931 = vmatprep.mubr.msk.bf16.mxu0 %vm1017_vm0, %v1016_v0  ;;  %928 = vmatpush3.bf16.msra.mxu0 %v962_v12 }
 0x99a   :  { %929 = vmatprep.subr.bf16.mxu0 %v1016_v0 }
 0x99d   :  { %930 = vmatpush3.bf16.msra.mxu0 %v964_v14 }
 0xa6b   :  { %v500_v18 = vpop.f32.mrb[8].mxu0 }
 0xa6c   :  { %v506_v19 = vmul.f32 %v500_v18, %v500_v18  ;;  %v917_v20 = vpop.f32.mrb[9].mxu0 }
 0xa6d   :  { %v503_v21 = vpop.f32.mrb[10].mxu0 }
 0xa6e   :  { %508 = vrot.lane.b32.xlu0 %v506_v19, %s1018_s18  ;;  %v918_v22 = vpop.f32.mrb[11].mxu0 }
 0xae0   :  { %v509_v23 = vpop.permute.xlu0 %508 }
 0xae1   :  { %v511_v24 = vsel %vm102_vm2, %v500_v18, %v509_v23 }
 0xae2   :  { %v512_v25 = vsel %vm104_vm3, %v511_v24, 0.0 }
 0xae3   :  { %v513_v26 = vrot.slane %v512_v25, 4 }
 0xae5   :  { %v514_v27 = vadd.f32 %v513_v26, %v512_v25  ;;  %v853_v25 = vld [vmem:[%s1211_s5 + $0x1] ss:$0 sm:$0xff] }
 0xae7   :  { %v515_v28 = vrot.slane %v514_v27, 2 }
 0xae9   :  { %v516_v31 = vadd.f32 %v515_v28, %v514_v27 }
 0xaeb   :  { %v517_v32 = vrot.slane %v516_v31, 1 }
 0xaed   :  { %v518_v34 = vadd.f32 %v517_v32, %v516_v31 }
 0xaef   :  { %v519_v35 = vmul.f32 0.125, %v518_v34 }
 0xaf1   :  { %v520_v36 = vmul.f32 %v519_v35, %v519_v35 }
 0xaf3   :  { %522 = vrot.lane.b32.xlu1 %v520_v36, %s1018_s18 }
 0xb65   :  { %v523_v37 = vpop.permute.xlu1 %522 }
 0xb66   :  { %v525_v38 = vsub.f32 %v519_v35, %v523_v37 }
 0xb68   :  { %v526_v39 = vmax.f32 %v525_v38, 0.0 }
 0xb6a   :  { %v527_v40 = vadd.f32 1e-05, %v526_v39 }
 0xb6c   :  { %973 = vrsqrt.f32 %v527_v40 }
 0xb76   :  { %v974_v43 = vpop.eup %973 }
 0xb77   :  { %530 = vrot.lane.b32.xlu0 %v974_v43, %s1019_s0 }
 0xbe9   :  { %v531_v44 = vpop.permute.xlu0 %530 }
 0xbea   :  { %v533_v45 = vmul.f32 %v531_v44, %v1097_v29 }
 0xbec   :  { %v534_v46 = vmul.f32 %v533_v45, %v519_v35  ;;  %v539_v47 = vrot.slane %v533_v45, %v1099_v30 }
 0xbee   :  { %v535_v48 = vsub.f32 %v1105_v33, %v534_v46  ;;  %v540_v49 = vmul.f32 %v539_v47, %v500_v18  ;;  %v844_v47 = vld [vmem:[%s1211_s5] ss:$0 sm:$0xff] }
 0xbf0   :  { %v544_v50 = vrot.slane %v535_v48, %v1099_v30 }
 0xbf2   :  { %v545_v51 = vadd.f32 %v544_v50, %v540_v49  ;;  %v796_v49 = vld [vmem:[%s1207_s1] sm:$0xff] }
 0xbf4   :  { %v546_v52 = vmax.f32 %v545_v51, 0.0 }
 0xbf6   :  { %v552_v53 = vpack.c.bf16 %v546_v52, %v546_v52 }
 0xbf8   :  { %924 = vmatmul.mubr.msk.bf16.vlgmr.msra.gmra.mrb[8].mxu1 %vm102_vm2, %v552_v53 }
 0xbf9   :  { %939 = vmatprep.mubr.msk.bf16.mxu1 %vm1017_vm0, %v1016_v0  ;;  %936 = vmatpush3.bf16.msra.mxu1 %v961_v11 }
 0xbfa   :  { %937 = vmatprep.subr.bf16.mxu1 %v1016_v0 }
 0xbfd   :  { %938 = vmatpush3.bf16.msra.mxu1 %v963_v13 }
 0xccb   :  { %v602_v54 = vpop.f32.mrb[8].mxu1 }
 0xccc   :  { %v608_v55 = vmul.f32 %v602_v54, %v602_v54  ;;  %v925_v56 = vpop.f32.mrb[9].mxu1 }
 0xccd   :  { %v605_v57 = vpop.f32.mrb[10].mxu1 }
 0xcce   :  { %610 = vrot.lane.b32.xlu1 %v608_v55, %s1018_s18  ;;  %v926_v58 = vpop.f32.mrb[11].mxu1 }
 0xd40   :  { %v611_v59 = vpop.permute.xlu1 %610 }
 0xd41   :  { %v613_v60 = vsel %vm102_vm2, %v602_v54, %v611_v59  ;;  %v799_v59 = vmul.f32 -0.5, %v796_v49 }
 0xd42   :  { %v614_v61 = vsel %vm104_vm3, %v613_v60, 0.0 }
 0xd43   :  { %v615_v62 = vrot.slane %v614_v61, 4 }
 0xd45   :  { %v616_v63 = vadd.f32 %v615_v62, %v614_v61  ;;  %v800_v61 = vmul.f32 %v799_v59, %v796_v49 }
 0xd47   :  { %v617_v1 = vrot.slane %v616_v63, 2 }
 0xd49   :  { %v618_v2 = vadd.f32 %v617_v1, %v616_v63 }
 0xd4b   :  { %v619_v3 = vrot.slane %v618_v2, 1 }
 0xd4d   :  { %v620_v4 = vadd.f32 %v619_v3, %v618_v2 }
 0xd4f   :  { %v621_v5 = vmul.f32 0.125, %v620_v4 }
 0xd51   :  { %v622_v6 = vmul.f32 %v621_v5, %v621_v5 }
 0xd53   :  { %624 = vrot.lane.b32.xlu0 %v622_v6, %s1018_s18 }
 0xdc5   :  { %v625_v7 = vpop.permute.xlu0 %624 }
 0xdc6   :  { %v627_v8 = vsub.f32 %v621_v5, %v625_v7 }
 0xdc8   :  { %v628_v9 = vmax.f32 %v627_v8, 0.0 }
 0xdca   :  { %v629_v10 = vadd.f32 1e-05, %v628_v9 }
 0xdcc   :  { %975 = vrsqrt.f32 %v629_v10 }
 0xdd6   :  { %v976_v15 = vpop.eup %975 }
 0xdd7   :  { %632 = vrot.lane.b32.xlu1 %v976_v15, %s1019_s0 }
 0xe49   :  { %v633_v16 = vpop.permute.xlu1 %632 }
 0xe4a   :  { %v635_v17 = vmul.f32 %v633_v16, %v1097_v29 }
 0xe4c   :  { %v636_v18 = vmul.f32 %v635_v17, %v621_v5  ;;  %v641_v19 = vrot.slane %v635_v17, %v1099_v30 }
 0xe4e   :  { %v637_v0 = vsub.f32 %v1105_v33, %v636_v18  ;;  %v642_v20 = vmul.f32 %v641_v19, %v602_v54 }
 0xe50   :  { %v646_v21 = vrot.slane %v637_v0, %v1099_v30 }
 0xe52   :  { %v647_v22 = vadd.f32 %v646_v21, %v642_v20 }
 0xe54   :  { %v648_v23 = vmax.f32 %v647_v22, 0.0 }
 0xe56   :  { %v653_v24 = vpack.c.bf16 %v648_v23, %v648_v23 }
 0xe58   :  { %932 = vmatmul.mubr.msk.bf16.vlgmr.msra.gmra.mrb[12].mxu0 %vm102_vm2, %v653_v24  ;;  %940 = vmatmul.mubr.msk.bf16.vlgmr.msra.gmra.mrb[12].mxu1 %vm102_vm2, %v653_v24 }
 0xf2b   :  { %v710_v29 = vpop.f32.mrb[12].mxu0  ;;  %v775_v26 = vpop.f32.mrb[12].mxu1 }
 0xf2c   :  { %v776_v27 = vadd.f32 %v853_v25, %v775_v26  ;;  %v933_v28 = vpop.f32.mrb[13].mxu0  ;;  %v941_v31 = vpop.f32.mrb[13].mxu1  ;;  %v711_v51 = vadd.f32 %v844_v47, %v710_v29 }
 0xf2d   :  { %v713_v33 = vpop.f32.mrb[14].mxu0  ;;  %v778_v32 = vpop.f32.mrb[14].mxu1 }
 0xf2e   :  { %v782_v34 = vand.u32 2147483647, %v776_v27  ;;  %v934_v30 = vpop.f32.mrb[15].mxu0  ;;  %v942_v35 = vpop.f32.mrb[15].mxu1  ;;  %v781_v46 = vmax.f32 %v776_v27, 0.0 }
 0xf30   :  { %v783_v36 = vsub.f32 0.0, %v782_v34 }
 0xf32   :  { %v784_v37 = vmul.f32 1.442695, %v783_v36 }
 0xf34   :  { %977 = vpow2.f32 %v784_v37 }
 0xf3e   :  { %v978_v38 = vpop.eup %977 }
 0xf3f   :  { %v786_v39 = vadd.f32 1.0, %v978_v38  ;;  %v789_v40 = vmul.f32 -0.5, %v978_v38  ;;  %v792_v42 = vand.u32 2147483647, %v978_v38 }
 0xf41   :  { %979 = vlog2.f32 %v786_v39  ;;  %v790_v41 = vadd.f32 1.0, %v789_v40  ;;  %vm793_vm4 = vcmp.lt.f32.partialorder %v792_v42, 0.0004427343 }
 0xf43   :  { %v791_v45 = vmul.f32 %v978_v38, %v790_v41 }
 0xf4b   :  { %v980_v43 = vpop.eup %979 }
 0xf4c   :  { %v788_v44 = vmul.f32 0.6931472, %v980_v43 }
 0xf4e   :  { %v794_v48 = vsel %vm793_vm4, %v791_v45, %v788_v44 }
 0xf4f   :  { %v795_v50 = vadd.f32 %v794_v48, %v781_v46 }
 0xf51   :  { %v797_v52 = vmul.f32 %v796_v49, %v795_v50 }
 0xf53   :  { %v798_v53 = vadd.f32 %v797_v52, %v711_v51 }
 0xf55   :  { %981 = vtanh.f32 %v798_v53 }
 0xf5f   :  { %v982_v54 = vpop.eup %981 }
 0xf60   :  { %983 = vtanh.f32 %v982_v54  ;;  %v813_v6 = vmul.f32 2.0, %v982_v54 }
 0xf61   :  { %985 = vlog2.f32 %v795_v50 }
 0xf6a   :  { %v984_v55 = vpop.eup %983 }
 0xf6b   :  { %v807_v56 = vmul.f32 %v984_v55, %v984_v55  ;;  %v986_v60 = vpop.eup %985 }
 0xf6c   :  { %v802_v62 = vmul.f32 0.6931472, %v986_v60 }
 0xf6d   :  { %v808_v57 = vsub.f32 1.0, %v807_v56 }
 0xf6e   :  { %v803_v63 = vsub.f32 %v800_v61, %v802_v62 }
 0xf6f   :  { %v809_v58 = vadd.f32 1e-07, %v808_v57 }
 0xf70   :  { %v857_v2 = vadd.f32 -0.9189385, %v803_v63 }
 0xf71   :  { %987 = vlog2.f32 %v809_v58 }
 0xf7b   :  { %v988_v1 = vpop.eup %987 }
 0xf7c   :  { %v811_v3 = vmul.f32 0.6931472, %v988_v1 }
 0xf7e   :  { %v812_v4 = vsub.f32 %v857_v2, %v811_v3 }
 0xf80   :  { %v815_v5 = vsel %vm814_vm5, %v812_v4, 0.0 }
 0xf81   :  { %816 = vadd.xlane.f32.xlu0 %v815_v5 }
0x100e   :  { %v817_v7 = vpop.xlane.xlu0 %816 }
0x100f   :  { %v818_v8 = vsel %vm814_vm5, %v813_v6, %v817_v7 }
0x1010   :  { %v820_v9 = vsel %vm819_vm6, %v818_v8, 0.0 }
0x1011   :  { %821 = vst [vmem:[%s1213_s7] sm:$0xff] %v820_v9 }
0x1012   :  { %826 = vsyncpa [#allocation3], 1 }

</bundles_post_ra>
